<compile_context>
chip_gen: v7x
topology: tpu7x:2x2x1
jax: 0.10.0
libtpu: 0.0.40
codegen_flags: <defaults>
</compile_context>

<pallas_src>
import functools

import jax
import jax.numpy as jnp
from jax.experimental import pallas as pl
from jax.experimental.pallas import tpu as pltpu


# ----------------------------------------------------------------------------
# Helpers
# ----------------------------------------------------------------------------
def _choose_tile(T, max_tile=512):
    """Largest note-tile <= max_tile that divides T (multiple of 8 when tiled)."""
    if T <= max_tile:
        return T
    for t in range(max_tile, 7, -8):
        if T % t == 0:
            return t
    return T


def _pad_lanes(n):
    """Pad a feature width up to a lane-dense multiple of 128."""
    return max(128, ((n + 127) // 128) * 128)


def _full_spec(shape):
    """Full-extent BlockSpec: keeps this array (weights/bias) resident in VMEM."""
    return pl.BlockSpec(tuple(shape), lambda b, t, _n=len(shape): (0,) * _n)


# ----------------------------------------------------------------------------
# Kernel 1: fused encoder (embedder -> score enc -> perf enc + mean-pool + head)
# ----------------------------------------------------------------------------
def _encoder_kernel(x_ref, y_ref,
                    emb_w_ref, emb_b_ref,
                    score_w_ref, score_b_ref,
                    pe_ws_ref, pe_wy_ref, pe_b_ref,
                    muvar_w_ref, muvar_b_ref,
                    muvar_ref,
                    acc_ref,
                    *, inv_t):
    t = pl.program_id(1)

    @pl.when(t == 0)
    def _():
        acc_ref[...] = jnp.zeros_like(acc_ref)

    x = x_ref[...]            # (tile_t, D_in)   bf16
    y = y_ref[...]            # (tile_t, D_out)  bf16

    # note_embedder: Linear + ReLU
    xe = jnp.maximum(
        jnp.dot(x, emb_w_ref[...], preferred_element_type=jnp.float32)
        + emb_b_ref[...], 0.0)
    # score_encoder: Linear + tanh   (graph/GRU structure not modelled)
    se = jnp.tanh(
        jnp.dot(xe.astype(jnp.bfloat16), score_w_ref[...],
                preferred_element_type=jnp.float32)
        + score_b_ref[...])
    # performance_encoder pre-pool: relu([se ; y] @ pe_w + b) via split weights
    h = jnp.maximum(
        jnp.dot(se.astype(jnp.bfloat16), pe_ws_ref[...],
                preferred_element_type=jnp.float32)
        + jnp.dot(y, pe_wy_ref[...], preferred_element_type=jnp.float32)
        + pe_b_ref[...], 0.0)

    # fused mean-pool over notes (T is the reduction grid axis)
    acc_ref[...] += jnp.sum(h, axis=0, keepdims=True)

    @pl.when(t == pl.num_programs(1) - 1)
    def _():
        pooled = (acc_ref[...] * inv_t).astype(jnp.bfloat16)       # (1, enc_hidden)
        # packed (mu | log_var) head into a lane-dense 128-wide slab
        muvar_ref[...] = (jnp.dot(pooled, muvar_w_ref[...],
                                  preferred_element_type=jnp.float32)
                          + muvar_b_ref[...])                      # (1, enc_pad)


def encode_mu_logvar(params, x_bf, y_bf, tile_t, latent):
    """Returns packed (mu | log_var) of shape (B, 2*latent)."""
    B, T, D_in = x_bf.shape
    D_out = y_bf.shape[-1]
    enc_hidden = params["pe_ws"].shape[1]
    enc_pad = params["muvar_w"].shape[1]   # lane-dense (>=128)
    num_t = T // tile_t

    kernel = functools.partial(_encoder_kernel, inv_t=1.0 / T)

    muvar = pl.pallas_call(
        kernel,
        out_shape=jax.ShapeDtypeStruct((B, 1, enc_pad), jnp.float32),
        grid_spec=pltpu.PrefetchScalarGridSpec(
            num_scalar_prefetch=0,
            grid=(B, num_t),
            in_specs=[
                pl.BlockSpec((None, tile_t, D_in), lambda b, t: (b, t, 0)),
                pl.BlockSpec((None, tile_t, D_out), lambda b, t: (b, t, 0)),
                _full_spec(params["emb_w"].shape),
                _full_spec(params["emb_b"].shape),
                _full_spec(params["score_w"].shape),
                _full_spec(params["score_b"].shape),
                _full_spec(params["pe_ws"].shape),
                _full_spec(params["pe_wy"].shape),
                _full_spec(params["pe_b"].shape),
                _full_spec(params["muvar_w"].shape),
                _full_spec(params["muvar_b"].shape),
            ],
            out_specs=pl.BlockSpec((None, 1, enc_pad), lambda b, t: (b, 0, 0)),
            scratch_shapes=[pltpu.VMEM((1, enc_hidden), jnp.float32)],
        ),
        compiler_params=pltpu.CompilerParams(
            dimension_semantics=("parallel", "arbitrary")),
    )(x_bf, y_bf,
      params["emb_w"], params["emb_b"],
      params["score_w"], params["score_b"],
      params["pe_ws"], params["pe_wy"], params["pe_b"],
      params["muvar_w"], params["muvar_b"])
    return muvar[:, 0, :2 * latent]


# ----------------------------------------------------------------------------
# Kernel 2: fused decoder (recompute score emb -> decoder hidden -> packed heads)
# ----------------------------------------------------------------------------
def _decoder_kernel(x_ref, z_ref,
                    emb_w_ref, emb_b_ref,
                    score_w_ref, score_b_ref,
                    dec_ws_ref, dec_wz_ref, dec_wx_ref, dec_b_ref,
                    head_w_ref, head_b_ref,
                    out_ref):
    x = x_ref[...]            # (tile_t, D_in)  bf16
    z = z_ref[...]            # (1, latent)     bf16

    # recompute note/score embedding (cheaper than an HBM round trip)
    xe = jnp.maximum(
        jnp.dot(x, emb_w_ref[...], preferred_element_type=jnp.float32)
        + emb_b_ref[...], 0.0)
    se = jnp.tanh(
        jnp.dot(xe.astype(jnp.bfloat16), score_w_ref[...],
                preferred_element_type=jnp.float32)
        + score_b_ref[...])

    # decoder hidden: relu([se ; z ; residual] @ dec_w + b) via split weights.
    # z contribution is a single broadcast row; residual contribution reuses the
    # raw x tile through a zero-padded weight (no concat / broadcast_to / slice).
    zc = jnp.dot(z, dec_wz_ref[...], preferred_element_type=jnp.float32)
    h2 = jnp.maximum(
        jnp.dot(se.astype(jnp.bfloat16), dec_ws_ref[...],
                preferred_element_type=jnp.float32)
        + jnp.dot(x, dec_wx_ref[...], preferred_element_type=jnp.float32)
        + zc
        + dec_b_ref[...], 0.0)

    # packed (output | alter) head into a lane-dense 128-wide slab
    out = (jnp.dot(h2.astype(jnp.bfloat16), head_w_ref[...],
                   preferred_element_type=jnp.float32)
           + head_b_ref[...])
    out_ref[...] = out.astype(out_ref.dtype)


def decode(params, x_bf, z_bf, tile_t, d_out):
    B, T, D_in = x_bf.shape
    latent = z_bf.shape[-1]
    pad_n = params["head_w"].shape[1]      # lane-dense (>=128)
    num_t = T // tile_t

    out = pl.pallas_call(
        _decoder_kernel,
        out_shape=jax.ShapeDtypeStruct((B, T, pad_n), jnp.float32),
        grid_spec=pltpu.PrefetchScalarGridSpec(
            num_scalar_prefetch=0,
            grid=(B, num_t),
            in_specs=[
                pl.BlockSpec((None, tile_t, D_in), lambda b, t: (b, t, 0)),
                pl.BlockSpec((None, 1, latent), lambda b, t: (b, 0, 0)),
                _full_spec(params["emb_w"].shape),
                _full_spec(params["emb_b"].shape),
                _full_spec(params["score_w"].shape),
                _full_spec(params["score_b"].shape),
                _full_spec(params["dec_ws"].shape),
                _full_spec(params["dec_wz"].shape),
                _full_spec(params["dec_wx"].shape),
                _full_spec(params["dec_b"].shape),
                _full_spec(params["head_w"].shape),
                _full_spec(params["head_b"].shape),
            ],
            out_specs=pl.BlockSpec((None, tile_t, pad_n), lambda b, t: (b, t, 0)),
        ),
        compiler_params=pltpu.CompilerParams(
            dimension_semantics=("parallel", "parallel")),
    )(x_bf, z_bf.reshape(B, 1, latent),
      params["emb_w"], params["emb_b"],
      params["score_w"], params["score_b"],
      params["dec_ws"], params["dec_wz"], params["dec_wx"], params["dec_b"],
      params["head_w"], params["head_b"])
    return out[..., :d_out], out[..., d_out:d_out + 1]


# ----------------------------------------------------------------------------
# Parameters (weights pre-split / packed / padded; bf16 weights, f32 biases)
# ----------------------------------------------------------------------------
def init_params(key, d_in, d_out, note_hidden, score_hidden, enc_hidden,
                latent, dec_hidden, n_residual):
    def dense(k, kin, n, scale=0.1):
        kw, kb = jax.random.split(k)
        return (scale * jax.random.normal(kw, (kin, n), jnp.float32),
                scale * jax.random.normal(kb, (n,), jnp.float32))

    keys = jax.random.split(key, 8)
    emb_w, emb_b = dense(keys[0], d_in, note_hidden)
    score_w, score_b = dense(keys[1], note_hidden, score_hidden)
    pe_w, pe_b = dense(keys[2], score_hidden + d_out, enc_hidden)
    mu_w, mu_b = dense(keys[3], enc_hidden, latent)
    var_w, var_b = dense(keys[4], enc_hidden, latent)   # log-variance head
    dec_w, dec_b = dense(keys[5], score_hidden + latent + n_residual, dec_hidden)
    out_w, out_b = dense(keys[6], dec_hidden, d_out)
    alt_w, alt_b = dense(keys[7], dec_hidden, 1)

    bf = lambda a: a.astype(jnp.bfloat16)
    row = lambda b: b.reshape(1, -1).astype(jnp.float32)

    # split pe_w into score-embedding / y contributions (removes the concat)
    pe_ws, pe_wy = pe_w[:score_hidden], pe_w[score_hidden:]

    # pack mu | log_var heads into one matmul, zero-padded to a lane-dense slab
    enc_pad = _pad_lanes(2 * latent)
    muvar_w = jnp.zeros((enc_hidden, enc_pad), jnp.float32)
    muvar_w = muvar_w.at[:, :latent].set(mu_w).at[:, latent:2 * latent].set(var_w)
    muvar_b = jnp.zeros((enc_pad,), jnp.float32)
    muvar_b = muvar_b.at[:latent].set(mu_b).at[latent:2 * latent].set(var_b)

    # split dec_w into score / z / residual contributions; residual weight is
    # zero-padded to D_in so the raw x tile is reused directly (no slice/concat)
    dec_ws = dec_w[:score_hidden]
    dec_wz = dec_w[score_hidden:score_hidden + latent]
    dec_wr = dec_w[score_hidden + latent:]
    dec_wx = jnp.zeros((d_in, dec_hidden), jnp.float32).at[:n_residual].set(dec_wr)

    # pack output | alter heads, zero-padded to a lane-dense 128-wide output
    head_pad = _pad_lanes(d_out + 1)
    head_w = jnp.zeros((dec_hidden, head_pad), jnp.float32)
    head_w = head_w.at[:, :d_out].set(out_w).at[:, d_out].set(alt_w[:, 0])
    head_b = jnp.zeros((head_pad,), jnp.float32)
    head_b = head_b.at[:d_out].set(out_b).at[d_out].set(alt_b[0])

    return dict(
        emb_w=bf(emb_w), emb_b=row(emb_b),
        score_w=bf(score_w), score_b=row(score_b),
        pe_ws=bf(pe_ws), pe_wy=bf(pe_wy), pe_b=row(pe_b),
        muvar_w=bf(muvar_w), muvar_b=row(muvar_b),
        dec_ws=bf(dec_ws), dec_wz=bf(dec_wz), dec_wx=bf(dec_wx), dec_b=row(dec_b),
        head_w=bf(head_w), head_b=row(head_b),
    )


# ----------------------------------------------------------------------------
# VirtuosoNet forward
# ----------------------------------------------------------------------------
def virtuoso_forward(params, x, y, *, latent, rng_key=None, initial_z=None):
    B, T, _ = x.shape
    d_out = y.shape[-1]
    tile_t = _choose_tile(T)
    assert T % tile_t == 0

    x_bf = x.astype(jnp.bfloat16)
    y_bf = y.astype(jnp.bfloat16)

    if initial_z is None:
        muvar = encode_mu_logvar(params, x_bf, y_bf, tile_t, latent)  # (B, 2*latent)
        perform_mu = muvar[:, :latent]
        perform_var = muvar[:, latent:]   # NOTE: this is the LOG-variance
        if rng_key is None:
            rng_key = jax.random.PRNGKey(0)
        eps = jax.random.normal(rng_key, perform_mu.shape, jnp.float32)
        z = perform_mu + jnp.exp(0.5 * perform_var) * eps             # reparameterize
    else:
        z = jnp.asarray(initial_z, jnp.float32).reshape(B, -1)
        # original module returns python ints (0, 0); arrays keep shapes stable
        perform_mu = jnp.zeros((B, latent), jnp.float32)
        perform_var = jnp.zeros((B, latent), jnp.float32)

    output, alter_out = decode(params, x_bf, z.astype(jnp.bfloat16), tile_t, d_out)
    return output, perform_mu, perform_var, alter_out


# ----------------------------------------------------------------------------
# Demo
# ----------------------------------------------------------------------------
if __name__ == "__main__":
    B, T = 2, 8          # batch, num_notes
    D_IN = 16            # score input features
    D_OUT = 11           # performance output features
    NOTE_HIDDEN = 32
    SCORE_HIDDEN = 32
    ENC_HIDDEN = 32
    LATENT = 8
    DEC_HIDDEN = 32
    N_RESIDUAL = 4

    root = jax.random.PRNGKey(0)
    kx, ky, kp, kz = jax.random.split(root, 4)
    x = jax.random.normal(kx, (B, T, D_IN), jnp.float32)
    y = jax.random.normal(ky, (B, T, D_OUT), jnp.float32)

    params = init_params(kp, D_IN, D_OUT, NOTE_HIDDEN, SCORE_HIDDEN,
                         ENC_HIDDEN, LATENT, DEC_HIDDEN, N_RESIDUAL)

    fwd = jax.jit(lambda xx, yy, key: virtuoso_forward(
        params, xx, yy, latent=LATENT, rng_key=key))

    output, mu, log_var, alter_out = fwd(x, y, kz)
    jax.block_until_ready(output)
    jax.block_until_ready(alter_out)

    assert output.shape == (B, T, D_OUT)
    assert mu.shape == (B, LATENT)
    assert log_var.shape == (B, LATENT)
    assert alter_out.shape == (B, T, 1)

    # also exercise the initial_z branch once
    out2, mu2, var2, alt2 = virtuoso_forward(
        params, x, y, latent=LATENT, initial_z=jnp.zeros((B, LATENT)))
    jax.block_until_ready(out2)
    assert out2.shape == (B, T, D_OUT) and mu2.shape == (B, LATENT)

    print("KERNEL_OK")
</pallas_src>

<mosaic_0001>
module attributes {stable_mosaic.version = 11 : i64} {
  func.func @_encoder_kernel(%arg0: i32, %arg1: i32, %arg2: memref<1x8x16xbf16, #tpu.memory_space<vmem>>, %arg3: memref<1x8x11xbf16, #tpu.memory_space<vmem>>, %arg4: memref<16x32xbf16, #tpu.memory_space<vmem>>, %arg5: memref<1x32xf32, #tpu.memory_space<vmem>>, %arg6: memref<32x32xbf16, #tpu.memory_space<vmem>>, %arg7: memref<1x32xf32, #tpu.memory_space<vmem>>, %arg8: memref<32x32xbf16, #tpu.memory_space<vmem>>, %arg9: memref<11x32xbf16, #tpu.memory_space<vmem>>, %arg10: memref<1x32xf32, #tpu.memory_space<vmem>>, %arg11: memref<32x128xbf16, #tpu.memory_space<vmem>>, %arg12: memref<1x128xf32, #tpu.memory_space<vmem>>, %arg13: memref<1x1x128xf32, #tpu.memory_space<vmem>>, %arg14: memref<1x32xf32, #tpu.memory_space<vmem>>) attributes {dimension_semantics = [#tpu.dimension_semantics<parallel>, #tpu.dimension_semantics<arbitrary>], iteration_bounds = array<i64: 2, 1>, scalar_prefetch = 0 : i64, scratch_operands = 1 : i64, tpu.core_type = #tpu.core_type<tc>, window_params = [{transform_indices = @transform_0, window_bounds = array<i64: 1, 8, 16>}, {transform_indices = @transform_1, window_bounds = array<i64: 1, 8, 11>}, {pipeline_mode = #tpu.pipeline_mode<synchronous>, transform_indices = @transform_2, window_bounds = array<i64: 16, 32>}, {pipeline_mode = #tpu.pipeline_mode<synchronous>, transform_indices = @transform_3, window_bounds = array<i64: 1, 32>}, {pipeline_mode = #tpu.pipeline_mode<synchronous>, transform_indices = @transform_4, window_bounds = array<i64: 32, 32>}, {pipeline_mode = #tpu.pipeline_mode<synchronous>, transform_indices = @transform_5, window_bounds = array<i64: 1, 32>}, {pipeline_mode = #tpu.pipeline_mode<synchronous>, transform_indices = @transform_6, window_bounds = array<i64: 32, 32>}, {pipeline_mode = #tpu.pipeline_mode<synchronous>, transform_indices = @transform_7, window_bounds = array<i64: 11, 32>}, {pipeline_mode = #tpu.pipeline_mode<synchronous>, transform_indices = @transform_8, window_bounds = array<i64: 1, 32>}, {pipeline_mode = #tpu.pipeline_mode<synchronous>, transform_indices = @transform_9, window_bounds = array<i64: 32, 128>}, {pipeline_mode = #tpu.pipeline_mode<synchronous>, transform_indices = @transform_10, window_bounds = array<i64: 1, 128>}, {transform_indices = @transform_11, window_bounds = array<i64: 1, 1, 128>}]} {
    %c0_i32 = arith.constant 0 : i32
    %0 = arith.cmpi eq, %arg1, %c0_i32 : i32
    %1 = arith.extui %0 : i1 to i32
    %c0_i32_0 = arith.constant 0 : i32
    %2 = arith.cmpi ne, %1, %c0_i32_0 : i32
    scf.if %2 {
      %cst_32 = arith.constant 0.000000e+00 : f32
      %40 = vector.broadcast %cst_32 : f32 to vector<1x32xf32>
      %c0_33 = arith.constant 0 : index
      %c0_34 = arith.constant 0 : index
      %41 = vector.load %arg14[%c0_33, %c0_34] : memref<1x32xf32, #tpu.memory_space<vmem>>, vector<1x32xf32>
      tpu.vector_store %arg14[%c0_33, %c0_34], %40 {strides = array<i32>} : memref<1x32xf32, #tpu.memory_space<vmem>>, vector<1x32xf32>,
    } else {
    }
    %c0 = arith.constant 0 : index
    %c0_1 = arith.constant 0 : index
    %c0_2 = arith.constant 0 : index
    %3 = vector.load %arg2[%c0, %c0_1, %c0_2] : memref<1x8x16xbf16, #tpu.memory_space<vmem>>, vector<1x8x16xbf16>
    %4 = vector.shape_cast %3 : vector<1x8x16xbf16> to vector<8x16xbf16>
    %c0_3 = arith.constant 0 : index
    %c0_4 = arith.constant 0 : index
    %c0_5 = arith.constant 0 : index
    %5 = vector.load %arg3[%c0_3, %c0_4, %c0_5] : memref<1x8x11xbf16, #tpu.memory_space<vmem>>, vector<1x8x11xbf16>
    %6 = vector.shape_cast %5 : vector<1x8x11xbf16> to vector<8x11xbf16>
    %c0_6 = arith.constant 0 : index
    %c0_7 = arith.constant 0 : index
    %7 = vector.load %arg4[%c0_6, %c0_7] : memref<16x32xbf16, #tpu.memory_space<vmem>>, vector<16x32xbf16>
    %cst = arith.constant dense<0.000000e+00> : vector<8x32xf32>
    %8 = tpu.matmul %4, %7, %cst {dimension_numbers = #tpu.dot_dimension_numbers<[1], [0], [0], [1], [0, 0, 1, 1], [], []>} : vector<8x16xbf16>, vector<16x32xbf16>, vector<8x32xf32> -> vector<8x32xf32>
    %c0_8 = arith.constant 0 : index
    %c0_9 = arith.constant 0 : index
    %9 = vector.load %arg5[%c0_8, %c0_9] : memref<1x32xf32, #tpu.memory_space<vmem>>, vector<1x32xf32>
    %10 = vector.broadcast %9 : vector<1x32xf32> to vector<8x32xf32>
    %11 = arith.addf %8, %10 : vector<8x32xf32>
    %cst_10 = arith.constant 0.000000e+00 : f32
    %12 = vector.broadcast %cst_10 : f32 to vector<8x32xf32>
    %13 = arith.maximumf %11, %12 : vector<8x32xf32>
    %14 = arith.truncf %13 : vector<8x32xf32> to vector<8x32xbf16>
    %c0_11 = arith.constant 0 : index
    %c0_12 = arith.constant 0 : index
    %15 = vector.load %arg6[%c0_11, %c0_12] : memref<32x32xbf16, #tpu.memory_space<vmem>>, vector<32x32xbf16>
    %cst_13 = arith.constant dense<0.000000e+00> : vector<8x32xf32>
    %16 = tpu.matmul %14, %15, %cst_13 {dimension_numbers = #tpu.dot_dimension_numbers<[1], [0], [0], [1], [0, 0, 1, 1], [], []>} : vector<8x32xbf16>, vector<32x32xbf16>, vector<8x32xf32> -> vector<8x32xf32>
    %c0_14 = arith.constant 0 : index
    %c0_15 = arith.constant 0 : index
    %17 = vector.load %arg7[%c0_14, %c0_15] : memref<1x32xf32, #tpu.memory_space<vmem>>, vector<1x32xf32>
    %18 = vector.broadcast %17 : vector<1x32xf32> to vector<8x32xf32>
    %19 = arith.addf %16, %18 : vector<8x32xf32>
    %20 = math.tanh %19 : vector<8x32xf32>
    %21 = arith.truncf %20 : vector<8x32xf32> to vector<8x32xbf16>
    %c0_16 = arith.constant 0 : index
    %c0_17 = arith.constant 0 : index
    %22 = vector.load %arg8[%c0_16, %c0_17] : memref<32x32xbf16, #tpu.memory_space<vmem>>, vector<32x32xbf16>
    %cst_18 = arith.constant dense<0.000000e+00> : vector<8x32xf32>
    %23 = tpu.matmul %21, %22, %cst_18 {dimension_numbers = #tpu.dot_dimension_numbers<[1], [0], [0], [1], [0, 0, 1, 1], [], []>} : vector<8x32xbf16>, vector<32x32xbf16>, vector<8x32xf32> -> vector<8x32xf32>
    %c0_19 = arith.constant 0 : index
    %c0_20 = arith.constant 0 : index
    %24 = vector.load %arg9[%c0_19, %c0_20] : memref<11x32xbf16, #tpu.memory_space<vmem>>, vector<11x32xbf16>
    %cst_21 = arith.constant dense<0.000000e+00> : vector<8x32xf32>
    %25 = tpu.matmul %6, %24, %cst_21 {dimension_numbers = #tpu.dot_dimension_numbers<[1], [0], [0], [1], [0, 0, 1, 1], [], []>} : vector<8x11xbf16>, vector<11x32xbf16>, vector<8x32xf32> -> vector<8x32xf32>
    %26 = arith.addf %23, %25 : vector<8x32xf32>
    %c0_22 = arith.constant 0 : index
    %c0_23 = arith.constant 0 : index
    %27 = vector.load %arg10[%c0_22, %c0_23] : memref<1x32xf32, #tpu.memory_space<vmem>>, vector<1x32xf32>
    %28 = vector.broadcast %27 : vector<1x32xf32> to vector<8x32xf32>
    %29 = arith.addf %26, %28 : vector<8x32xf32>
    %cst_24 = arith.constant 0.000000e+00 : f32
    %30 = vector.broadcast %cst_24 : f32 to vector<8x32xf32>
    %31 = arith.maximumf %29, %30 : vector<8x32xf32>
    %c0_25 = arith.constant 0 : index
    %c0_26 = arith.constant 0 : index
    %32 = vector.load %arg14[%c0_25, %c0_26] : memref<1x32xf32, #tpu.memory_space<vmem>>, vector<1x32xf32>
    %cst_27 = arith.constant dense<0.000000e+00> : vector<32xf32>
    %33 = vector.multi_reduction <add>, %31, %cst_27 [0] : vector<8x32xf32> to vector<32xf32>
    %34 = vector.shape_cast %33 : vector<32xf32> to vector<1x32xf32>
    %35 = arith.addf %32, %34 : vector<1x32xf32>
    %c0_28 = arith.constant 0 : index
    %c0_29 = arith.constant 0 : index
    %36 = vector.load %arg14[%c0_28, %c0_29] : memref<1x32xf32, #tpu.memory_space<vmem>>, vector<1x32xf32>
    tpu.vector_store %arg14[%c0_28, %c0_29], %35 {strides = array<i32>} : memref<1x32xf32, #tpu.memory_space<vmem>>, vector<1x32xf32>,
    %c0_i32_30 = arith.constant 0 : i32
    %37 = arith.cmpi eq, %arg1, %c0_i32_30 : i32
    %38 = arith.extui %37 : i1 to i32
    %c0_i32_31 = arith.constant 0 : i32
    %39 = arith.cmpi ne, %38, %c0_i32_31 : i32
    scf.if %39 {
      %c0_32 = arith.constant 0 : index
      %c0_33 = arith.constant 0 : index
      %40 = vector.load %arg14[%c0_32, %c0_33] : memref<1x32xf32, #tpu.memory_space<vmem>>, vector<1x32xf32>
      %cst_34 = arith.constant 1.250000e-01 : f32
      %41 = vector.broadcast %cst_34 : f32 to vector<1x32xf32>
      %42 = arith.mulf %40, %41 : vector<1x32xf32>
      %43 = arith.truncf %42 : vector<1x32xf32> to vector<1x32xbf16>
      %c0_35 = arith.constant 0 : index
      %c0_36 = arith.constant 0 : index
      %44 = vector.load %arg11[%c0_35, %c0_36] : memref<32x128xbf16, #tpu.memory_space<vmem>>, vector<32x128xbf16>
      %cst_37 = arith.constant dense<0.000000e+00> : vector<1x128xf32>
      %45 = tpu.matmul %43, %44, %cst_37 {dimension_numbers = #tpu.dot_dimension_numbers<[1], [0], [0], [1], [0, 0, 1, 1], [], []>} : vector<1x32xbf16>, vector<32x128xbf16>, vector<1x128xf32> -> vector<1x128xf32>
      %c0_38 = arith.constant 0 : index
      %c0_39 = arith.constant 0 : index
      %46 = vector.load %arg12[%c0_38, %c0_39] : memref<1x128xf32, #tpu.memory_space<vmem>>, vector<1x128xf32>
      %47 = arith.addf %45, %46 : vector<1x128xf32>
      %c0_40 = arith.constant 0 : index
      %c0_41 = arith.constant 0 : index
      %c0_42 = arith.constant 0 : index
      %48 = vector.load %arg13[%c0_40, %c0_41, %c0_42] : memref<1x1x128xf32, #tpu.memory_space<vmem>>, vector<1x1x128xf32>
      %49 = vector.shape_cast %48 : vector<1x1x128xf32> to vector<1x128xf32>
      %50 = vector.shape_cast %47 : vector<1x128xf32> to vector<1x1x128xf32>
      tpu.vector_store %arg13[%c0_40, %c0_41, %c0_42], %50 {strides = array<i32>} : memref<1x1x128xf32, #tpu.memory_space<vmem>>, vector<1x1x128xf32>,
    } else {
    }
    return
  }
  func.func @transform_0(%arg0: i32, %arg1: i32) -> (i32, i32, i32) {
    %c0_i32 = arith.constant 0 : i32
    %c0_i32_0 = arith.constant 0 : i32
    return %arg0, %arg1, %c0_i32 : i32, i32, i32
  }
  func.func @transform_1(%arg0: i32, %arg1: i32) -> (i32, i32, i32) {
    %c0_i32 = arith.constant 0 : i32
    %c0_i32_0 = arith.constant 0 : i32
    return %arg0, %arg1, %c0_i32 : i32, i32, i32
  }
  func.func @transform_2(%arg0: i32, %arg1: i32) -> (i32, i32) {
    %c0_i32 = arith.constant 0 : i32
    %c0_i32_0 = arith.constant 0 : i32
    %c0_i32_1 = arith.constant 0 : i32
    return %c0_i32, %c0_i32_0 : i32, i32
  }
  func.func @transform_3(%arg0: i32, %arg1: i32) -> (i32, i32) {
    %c0_i32 = arith.constant 0 : i32
    %c0_i32_0 = arith.constant 0 : i32
    %c0_i32_1 = arith.constant 0 : i32
    return %c0_i32, %c0_i32_0 : i32, i32
  }
  func.func @transform_4(%arg0: i32, %arg1: i32) -> (i32, i32) {
    %c0_i32 = arith.constant 0 : i32
    %c0_i32_0 = arith.constant 0 : i32
    %c0_i32_1 = arith.constant 0 : i32
    return %c0_i32, %c0_i32_0 : i32, i32
  }
  func.func @transform_5(%arg0: i32, %arg1: i32) -> (i32, i32) {
    %c0_i32 = arith.constant 0 : i32
    %c0_i32_0 = arith.constant 0 : i32
    %c0_i32_1 = arith.constant 0 : i32
    return %c0_i32, %c0_i32_0 : i32, i32
  }
  func.func @transform_6(%arg0: i32, %arg1: i32) -> (i32, i32) {
    %c0_i32 = arith.constant 0 : i32
    %c0_i32_0 = arith.constant 0 : i32
    %c0_i32_1 = arith.constant 0 : i32
    return %c0_i32, %c0_i32_0 : i32, i32
  }
  func.func @transform_7(%arg0: i32, %arg1: i32) -> (i32, i32) {
    %c0_i32 = arith.constant 0 : i32
    %c0_i32_0 = arith.constant 0 : i32
    %c0_i32_1 = arith.constant 0 : i32
    return %c0_i32, %c0_i32_0 : i32, i32
  }
  func.func @transform_8(%arg0: i32, %arg1: i32) -> (i32, i32) {
    %c0_i32 = arith.constant 0 : i32
    %c0_i32_0 = arith.constant 0 : i32
    %c0_i32_1 = arith.constant 0 : i32
    return %c0_i32, %c0_i32_0 : i32, i32
  }
  func.func @transform_9(%arg0: i32, %arg1: i32) -> (i32, i32) {
    %c0_i32 = arith.constant 0 : i32
    %c0_i32_0 = arith.constant 0 : i32
    %c0_i32_1 = arith.constant 0 : i32
    return %c0_i32, %c0_i32_0 : i32, i32
  }
  func.func @transform_10(%arg0: i32, %arg1: i32) -> (i32, i32) {
    %c0_i32 = arith.constant 0 : i32
    %c0_i32_0 = arith.constant 0 : i32
    %c0_i32_1 = arith.constant 0 : i32
    return %c0_i32, %c0_i32_0 : i32, i32
  }
  func.func @transform_11(%arg0: i32, %arg1: i32) -> (i32, i32, i32) {
    %c0_i32 = arith.constant 0 : i32
    %c0_i32_0 = arith.constant 0 : i32
    %c0_i32_1 = arith.constant 0 : i32
    return %arg0, %c0_i32, %c0_i32_0 : i32, i32, i32
  }
}

module attributes {stable_mosaic.version = 11 : i64} {
  func.func @_decoder_kernel(%arg0: i32, %arg1: i32, %arg2: memref<1x8x16xbf16, #tpu.memory_space<vmem>>, %arg3: memref<1x1x8xbf16, #tpu.memory_space<vmem>>, %arg4: memref<16x32xbf16, #tpu.memory_space<vmem>>, %arg5: memref<1x32xf32, #tpu.memory_space<vmem>>, %arg6: memref<32x32xbf16, #tpu.memory_space<vmem>>, %arg7: memref<1x32xf32, #tpu.memory_space<vmem>>, %arg8: memref<32x32xbf16, #tpu.memory_space<vmem>>, %arg9: memref<8x32xbf16, #tpu.memory_space<vmem>>, %arg10: memref<16x32xbf16, #tpu.memory_space<vmem>>, %arg11: memref<1x32xf32, #tpu.memory_space<vmem>>, %arg12: memref<32x128xbf16, #tpu.memory_space<vmem>>, %arg13: memref<1x128xf32, #tpu.memory_space<vmem>>, %arg14: memref<1x8x128xf32, #tpu.memory_space<vmem>>) attributes {dimension_semantics = [#tpu.dimension_semantics<parallel>, #tpu.dimension_semantics<parallel>], iteration_bounds = array<i64: 2, 1>, scalar_prefetch = 0 : i64, scratch_operands = 0 : i64, tpu.core_type = #tpu.core_type<tc>, window_params = [{transform_indices = @transform_0, window_bounds = array<i64: 1, 8, 16>}, {transform_indices = @transform_1, window_bounds = array<i64: 1, 1, 8>}, {pipeline_mode = #tpu.pipeline_mode<synchronous>, transform_indices = @transform_2, window_bounds = array<i64: 16, 32>}, {pipeline_mode = #tpu.pipeline_mode<synchronous>, transform_indices = @transform_3, window_bounds = array<i64: 1, 32>}, {pipeline_mode = #tpu.pipeline_mode<synchronous>, transform_indices = @transform_4, window_bounds = array<i64: 32, 32>}, {pipeline_mode = #tpu.pipeline_mode<synchronous>, transform_indices = @transform_5, window_bounds = array<i64: 1, 32>}, {pipeline_mode = #tpu.pipeline_mode<synchronous>, transform_indices = @transform_6, window_bounds = array<i64: 32, 32>}, {pipeline_mode = #tpu.pipeline_mode<synchronous>, transform_indices = @transform_7, window_bounds = array<i64: 8, 32>}, {pipeline_mode = #tpu.pipeline_mode<synchronous>, transform_indices = @transform_8, window_bounds = array<i64: 16, 32>}, {pipeline_mode = #tpu.pipeline_mode<synchronous>, transform_indices = @transform_9, window_bounds = array<i64: 1, 32>}, {pipeline_mode = #tpu.pipeline_mode<synchronous>, transform_indices = @transform_10, window_bounds = array<i64: 32, 128>}, {pipeline_mode = #tpu.pipeline_mode<synchronous>, transform_indices = @transform_11, window_bounds = array<i64: 1, 128>}, {transform_indices = @transform_12, window_bounds = array<i64: 1, 8, 128>}]} {
    %c0 = arith.constant 0 : index
    %c0_0 = arith.constant 0 : index
    %c0_1 = arith.constant 0 : index
    %0 = vector.load %arg2[%c0, %c0_0, %c0_1] : memref<1x8x16xbf16, #tpu.memory_space<vmem>>, vector<1x8x16xbf16>
    %1 = vector.shape_cast %0 : vector<1x8x16xbf16> to vector<8x16xbf16>
    %c0_2 = arith.constant 0 : index
    %c0_3 = arith.constant 0 : index
    %c0_4 = arith.constant 0 : index
    %2 = vector.load %arg3[%c0_2, %c0_3, %c0_4] : memref<1x1x8xbf16, #tpu.memory_space<vmem>>, vector<1x1x8xbf16>
    %3 = vector.shape_cast %2 : vector<1x1x8xbf16> to vector<1x8xbf16>
    %c0_5 = arith.constant 0 : index
    %c0_6 = arith.constant 0 : index
    %4 = vector.load %arg4[%c0_5, %c0_6] : memref<16x32xbf16, #tpu.memory_space<vmem>>, vector<16x32xbf16>
    %cst = arith.constant dense<0.000000e+00> : vector<8x32xf32>
    %5 = tpu.matmul %1, %4, %cst {dimension_numbers = #tpu.dot_dimension_numbers<[1], [0], [0], [1], [0, 0, 1, 1], [], []>} : vector<8x16xbf16>, vector<16x32xbf16>, vector<8x32xf32> -> vector<8x32xf32>
    %c0_7 = arith.constant 0 : index
    %c0_8 = arith.constant 0 : index
    %6 = vector.load %arg5[%c0_7, %c0_8] : memref<1x32xf32, #tpu.memory_space<vmem>>, vector<1x32xf32>
    %7 = vector.broadcast %6 : vector<1x32xf32> to vector<8x32xf32>
    %8 = arith.addf %5, %7 : vector<8x32xf32>
    %cst_9 = arith.constant 0.000000e+00 : f32
    %9 = vector.broadcast %cst_9 : f32 to vector<8x32xf32>
    %10 = arith.maximumf %8, %9 : vector<8x32xf32>
    %11 = arith.truncf %10 : vector<8x32xf32> to vector<8x32xbf16>
    %c0_10 = arith.constant 0 : index
    %c0_11 = arith.constant 0 : index
    %12 = vector.load %arg6[%c0_10, %c0_11] : memref<32x32xbf16, #tpu.memory_space<vmem>>, vector<32x32xbf16>
    %cst_12 = arith.constant dense<0.000000e+00> : vector<8x32xf32>
    %13 = tpu.matmul %11, %12, %cst_12 {dimension_numbers = #tpu.dot_dimension_numbers<[1], [0], [0], [1], [0, 0, 1, 1], [], []>} : vector<8x32xbf16>, vector<32x32xbf16>, vector<8x32xf32> -> vector<8x32xf32>
    %c0_13 = arith.constant 0 : index
    %c0_14 = arith.constant 0 : index
    %14 = vector.load %arg7[%c0_13, %c0_14] : memref<1x32xf32, #tpu.memory_space<vmem>>, vector<1x32xf32>
    %15 = vector.broadcast %14 : vector<1x32xf32> to vector<8x32xf32>
    %16 = arith.addf %13, %15 : vector<8x32xf32>
    %17 = math.tanh %16 : vector<8x32xf32>
    %c0_15 = arith.constant 0 : index
    %c0_16 = arith.constant 0 : index
    %18 = vector.load %arg9[%c0_15, %c0_16] : memref<8x32xbf16, #tpu.memory_space<vmem>>, vector<8x32xbf16>
    %cst_17 = arith.constant dense<0.000000e+00> : vector<1x32xf32>
    %19 = tpu.matmul %3, %18, %cst_17 {dimension_numbers = #tpu.dot_dimension_numbers<[1], [0], [0], [1], [0, 0, 1, 1], [], []>} : vector<1x8xbf16>, vector<8x32xbf16>, vector<1x32xf32> -> vector<1x32xf32>
    %20 = arith.truncf %17 : vector<8x32xf32> to vector<8x32xbf16>
    %c0_18 = arith.constant 0 : index
    %c0_19 = arith.constant 0 : index
    %21 = vector.load %arg8[%c0_18, %c0_19] : memref<32x32xbf16, #tpu.memory_space<vmem>>, vector<32x32xbf16>
    %cst_20 = arith.constant dense<0.000000e+00> : vector<8x32xf32>
    %22 = tpu.matmul %20, %21, %cst_20 {dimension_numbers = #tpu.dot_dimension_numbers<[1], [0], [0], [1], [0, 0, 1, 1], [], []>} : vector<8x32xbf16>, vector<32x32xbf16>, vector<8x32xf32> -> vector<8x32xf32>
    %c0_21 = arith.constant 0 : index
    %c0_22 = arith.constant 0 : index
    %23 = vector.load %arg10[%c0_21, %c0_22] : memref<16x32xbf16, #tpu.memory_space<vmem>>, vector<16x32xbf16>
    %cst_23 = arith.constant dense<0.000000e+00> : vector<8x32xf32>
    %24 = tpu.matmul %1, %23, %cst_23 {dimension_numbers = #tpu.dot_dimension_numbers<[1], [0], [0], [1], [0, 0, 1, 1], [], []>} : vector<8x16xbf16>, vector<16x32xbf16>, vector<8x32xf32> -> vector<8x32xf32>
    %25 = arith.addf %22, %24 : vector<8x32xf32>
    %26 = vector.broadcast %19 : vector<1x32xf32> to vector<8x32xf32>
    %27 = arith.addf %25, %26 : vector<8x32xf32>
    %c0_24 = arith.constant 0 : index
    %c0_25 = arith.constant 0 : index
    %28 = vector.load %arg11[%c0_24, %c0_25] : memref<1x32xf32, #tpu.memory_space<vmem>>, vector<1x32xf32>
    %29 = vector.broadcast %28 : vector<1x32xf32> to vector<8x32xf32>
    %30 = arith.addf %27, %29 : vector<8x32xf32>
    %cst_26 = arith.constant 0.000000e+00 : f32
    %31 = vector.broadcast %cst_26 : f32 to vector<8x32xf32>
    %32 = arith.maximumf %30, %31 : vector<8x32xf32>
    %33 = arith.truncf %32 : vector<8x32xf32> to vector<8x32xbf16>
    %c0_27 = arith.constant 0 : index
    %c0_28 = arith.constant 0 : index
    %34 = vector.load %arg12[%c0_27, %c0_28] : memref<32x128xbf16, #tpu.memory_space<vmem>>, vector<32x128xbf16>
    %cst_29 = arith.constant dense<0.000000e+00> : vector<8x128xf32>
    %35 = tpu.matmul %33, %34, %cst_29 {dimension_numbers = #tpu.dot_dimension_numbers<[1], [0], [0], [1], [0, 0, 1, 1], [], []>} : vector<8x32xbf16>, vector<32x128xbf16>, vector<8x128xf32> -> vector<8x128xf32>
    %c0_30 = arith.constant 0 : index
    %c0_31 = arith.constant 0 : index
    %36 = vector.load %arg13[%c0_30, %c0_31] : memref<1x128xf32, #tpu.memory_space<vmem>>, vector<1x128xf32>
    %37 = vector.broadcast %36 : vector<1x128xf32> to vector<8x128xf32>
    %38 = arith.addf %35, %37 : vector<8x128xf32>
    %c0_32 = arith.constant 0 : index
    %c0_33 = arith.constant 0 : index
    %c0_34 = arith.constant 0 : index
    %39 = vector.load %arg14[%c0_32, %c0_33, %c0_34] : memref<1x8x128xf32, #tpu.memory_space<vmem>>, vector<1x8x128xf32>
    %40 = vector.shape_cast %39 : vector<1x8x128xf32> to vector<8x128xf32>
    %41 = vector.shape_cast %38 : vector<8x128xf32> to vector<1x8x128xf32>
    tpu.vector_store %arg14[%c0_32, %c0_33, %c0_34], %41 {strides = array<i32>} : memref<1x8x128xf32, #tpu.memory_space<vmem>>, vector<1x8x128xf32>,
    return
  }
  func.func @transform_0(%arg0: i32, %arg1: i32) -> (i32, i32, i32) {
    %c0_i32 = arith.constant 0 : i32
    %c0_i32_0 = arith.constant 0 : i32
    return %arg0, %arg1, %c0_i32 : i32, i32, i32
  }
  func.func @transform_1(%arg0: i32, %arg1: i32) -> (i32, i32, i32) {
    %c0_i32 = arith.constant 0 : i32
    %c0_i32_0 = arith.constant 0 : i32
    %c0_i32_1 = arith.constant 0 : i32
    return %arg0, %c0_i32, %c0_i32_0 : i32, i32, i32
  }
  func.func @transform_2(%arg0: i32, %arg1: i32) -> (i32, i32) {
    %c0_i32 = arith.constant 0 : i32
    %c0_i32_0 = arith.constant 0 : i32
    %c0_i32_1 = arith.constant 0 : i32
    return %c0_i32, %c0_i32_0 : i32, i32
  }
  func.func @transform_3(%arg0: i32, %arg1: i32) -> (i32, i32) {
    %c0_i32 = arith.constant 0 : i32
    %c0_i32_0 = arith.constant 0 : i32
    %c0_i32_1 = arith.constant 0 : i32
    return %c0_i32, %c0_i32_0 : i32, i32
  }
  func.func @transform_4(%arg0: i32, %arg1: i32) -> (i32, i32) {
    %c0_i32 = arith.constant 0 : i32
    %c0_i32_0 = arith.constant 0 : i32
    %c0_i32_1 = arith.constant 0 : i32
    return %c0_i32, %c0_i32_0 : i32, i32
  }
  func.func @transform_5(%arg0: i32, %arg1: i32) -> (i32, i32) {
    %c0_i32 = arith.constant 0 : i32
    %c0_i32_0 = arith.constant 0 : i32
    %c0_i32_1 = arith.constant 0 : i32
    return %c0_i32, %c0_i32_0 : i32, i32
  }
  func.func @transform_6(%arg0: i32, %arg1: i32) -> (i32, i32) {
    %c0_i32 = arith.constant 0 : i32
    %c0_i32_0 = arith.constant 0 : i32
    %c0_i32_1 = arith.constant 0 : i32
    return %c0_i32, %c0_i32_0 : i32, i32
  }
  func.func @transform_7(%arg0: i32, %arg1: i32) -> (i32, i32) {
    %c0_i32 = arith.constant 0 : i32
    %c0_i32_0 = arith.constant 0 : i32
    %c0_i32_1 = arith.constant 0 : i32
    return %c0_i32, %c0_i32_0 : i32, i32
  }
  func.func @transform_8(%arg0: i32, %arg1: i32) -> (i32, i32) {
    %c0_i32 = arith.constant 0 : i32
    %c0_i32_0 = arith.constant 0 : i32
    %c0_i32_1 = arith.constant 0 : i32
    return %c0_i32, %c0_i32_0 : i32, i32
  }
  func.func @transform_9(%arg0: i32, %arg1: i32) -> (i32, i32) {
    %c0_i32 = arith.constant 0 : i32
    %c0_i32_0 = arith.constant 0 : i32
    %c0_i32_1 = arith.constant 0 : i32
    return %c0_i32, %c0_i32_0 : i32, i32
  }
  func.func @transform_10(%arg0: i32, %arg1: i32) -> (i32, i32) {
    %c0_i32 = arith.constant 0 : i32
    %c0_i32_0 = arith.constant 0 : i32
    %c0_i32_1 = arith.constant 0 : i32
    return %c0_i32, %c0_i32_0 : i32, i32
  }
  func.func @transform_11(%arg0: i32, %arg1: i32) -> (i32, i32) {
    %c0_i32 = arith.constant 0 : i32
    %c0_i32_0 = arith.constant 0 : i32
    %c0_i32_1 = arith.constant 0 : i32
    return %c0_i32, %c0_i32_0 : i32, i32
  }
  func.func @transform_12(%arg0: i32, %arg1: i32) -> (i32, i32, i32) {
    %c0_i32 = arith.constant 0 : i32
    %c0_i32_0 = arith.constant 0 : i32
    return %arg0, %arg1, %c0_i32 : i32, i32, i32
  }
}

</mosaic_0001>

<bundles_post_ra>
// kernel: _lambda_.3
= control target key start
LH: loop header
LB: loop body
LE: loop exit
PB: predicated region body
PF: predicated region fallthrough
CT: control target
= control target key end

     0   :  { %s1119_s21 = smov 0   ;;  %s1121_s22 = smov 0   ;;  %s1225_s0 = inlined_call_operand.vmem [shape: bf16[2,8,16], index: 0, kind: input, shape index: {}]   ;;  %s1226_s1 = inlined_call_operand.vmem [shape: bf16[2,1,8], index: 1, kind: input, shape index: {}]   ;;  %s1227_s2 = inlined_call_operand.vmem [shape: bf16[16,32], index: 2, kind: input, shape index: {}]   ;;  %s1228_s3 = inlined_call_operand.vmem [shape: f32[1,32], index: 3, kind: input, shape index: {}]   ;;  %s1229_s4 = inlined_call_operand.vmem [shape: bf16[32,32], index: 4, kind: input, shape index: {}]   ;;  %s1230_s5 = inlined_call_operand.vmem [shape: f32[1,32], index: 5, kind: input, shape index: {}]   ;;  %s1231_s6 = inlined_call_operand.vmem [shape: bf16[32,32], index: 6, kind: input, shape index: {}]   ;;  %s1232_s7 = inlined_call_operand.vmem [shape: bf16[8,32], index: 7, kind: input, shape index: {}]   ;;  %s1233_s8 = inlined_call_operand.vmem [shape: bf16[16,32], index: 8, kind: input, shape index: {}]   ;;  %s1234_s9 = inlined_call_operand.vmem [shape: f32[1,32], index: 9, kind: input, shape index: {}]   ;;  %s1235_s10 = inlined_call_operand.vmem [shape: bf16[32,128], index: 10, kind: input, shape index: {}]   ;;  %s1236_s11 = inlined_call_operand.vmem [shape: f32[1,128], index: 11, kind: input, shape index: {}]   ;;  %s1237_s12 = inlined_call_operand.vmem [shape: f32[2,8,128], index: 12, kind: output, shape index: {}]  }
   0x1   :  { %s1123_s23 = smov 0  }
   0x2 LB: > { %s34_s24 = sadd.s32 1, %s1046_s22  ;;  %p912_p0 = scmp.ge.s32.totalorder %s1050_s23, 1  ;;  %s1050_s23 = sphi %s1123_s23, %s22_s23   ;;  %s1046_s22 = sphi %s1121_s22, %s1239_s22   ;;  %s1042_s21 = sphi %s1119_s21, %s1238_s21  }
   0x3   : > { %p36_p1 = scmp.ge.s32.totalorder %s34_s24, 2  ;;  %p388_p2 = scmp.lt.s32.totalorder %s1050_s23, 3 }
   0x5   : > { %s1241_s24 = smov (%p36_p1, %s34_s24), 0  ;;  %p389_p3 = pnand %p912_p0, %p388_p2 }
   0x6   : > { %v1018_v0 = vld [vmem:[%s1227_s2] sm:$0xff] (!%p389_p3)   ;;  %v1052_v1 = vmov (!%p389_p3), 0.0   ;;  %p437_p4 = scmp.lt.s32.totalorder (!%p389_p3), %s1042_s21, 1  ;;  %vm1053_vm0 = vmmov (!%p389_p3), 0   ;;  %vm472_vm1 = vcmask (!%p389_p3), 130048   ;;  %v1020_v4 = vld [vmem:[%s1229_s4 + $0x8] sm:$0xff] (!%p389_p3)   ;;  %v743_v37 = vlaneseq (!%p389_p3) }
   0x7   : > { %392 = sbr.rel (%p389_p3) target bundleno = 900 (0x384), region = 68  ;;  %950 = vmatprep.subr.bf16.mxu0 (!%p389_p3), %v1052_v1  ;;  %956 = vmatprep.subr.bf16.mxu1 (!%p389_p3), %v1052_v1  ;;  %v1019_v3 = vld [vmem:[%s1229_s4] sm:$0xff] (!%p389_p3)   ;;  %vm541_vm2 = vcmask (!%p389_p3), 261120   ;;  %vm591_vm3 = vcmask (!%p389_p3), 1043456   ;;  %vm587_vm4 = vcmask (!%p389_p3), 64512   ;;  %v1023_v18 = vld [vmem:[%s1231_s6 + $0x8] sm:$0xff] (!%p389_p3)  }
   0x8   : > { %951 = vmatpush3.bf16.msra.mxu0 (!%p389_p3), %v1018_v0  ;;  %952 = vmatprep.mubr.msk.bf16.mxu0 (!%p389_p3), %vm1053_vm0, %v1052_v1  ;;  %v915_v5 = vld [vmem:[%s1228_s3] ss:$0 sm:$0xff] (!%p389_p3)  ;;  %v1025_v36 = vld [vmem:[%s1235_s10 + $0x8] sm:$0xff] (!%p389_p3)   ;;  %v744_v38 = vshrl.u32 (!%p389_p3), %v743_v37, 7 }
   0x9   : > { %960 = vmatprep.mubr.msk.bf16.mxu1 (!%p389_p3), %vm1053_vm0, %v1052_v1  ;;  %964 = vmatprep.subr.bf16.mxu0 (!%p389_p3), %v1052_v1  ;;  %v586_v13 = vld [vmem:[%s1232_s7] sm:$0xf] (!%p389_p3) }
   0xa   : > { %957 = vmatpush3.bf16.msra.mxu1 (!%p389_p3), %v1019_v3  ;;  %v593_v14 = vsel (!%p389_p3), %vm591_vm3, %v586_v13, 0  ;;  %v1022_v16 = vld [vmem:[%s1231_s6] sm:$0xff] (!%p389_p3)   ;;  %v745_v39 = vsub.s32 (!%p389_p3), 0, %v744_v38 }
   0xb   : > { %958 = vmatprep.subr.bf16.mxu1 (!%p389_p3), %v1052_v1  ;;  %v1021_v17 = vld [vmem:[%s1233_s8] sm:$0xff] (!%p389_p3)  }
   0xc   : > { %v918_v19 = vld [vmem:[%s1230_s5] ss:$0 sm:$0xff] (!%p389_p3) }
   0xd   : > { %v1024_v35 = vld [vmem:[%s1235_s10] sm:$0xff] (!%p389_p3)  }
   0xe   : > { %s1243_s21 = smov (!%p437_p4, %s1042_s21), 1  ;;  %959 = vmatpush3.bf16.msra.mxu1 %v1020_v4  ;;  %v928_v44 = vld [vmem:[%s1234_s9] ss:$0 sm:$0xff] }
   0xf   : > { %s913_s27 = sshll.u32 %s1243_s21, 2  ;;  %970 = vmatprep.subr.bf16.mxu1 %v1052_v1  ;;  %s914_s28 = sshll.u32 %s1243_s21, 3  ;;  %v929_v51 = vld [vmem:[%s1236_s11] ss:$0 sm:$0xff] }
  0x10   : > { %s443_s30 = scalar_lea.vmem %s1225_s0, %s913_s27  ;;  %s446_s27 = scalar_lea.vmem %s1226_s1, %s1243_s21 }
  0x11   : > { %v455_v2 = vld [vmem:[%s443_s30] sm:$0xf]  ;;  %s453_s15 = scalar_lea.vmem %s1237_s12, %s914_s28 }
  0x12   : > { %953 = vmatmul.mubr.msk.bf16.vlgmr.msra.gmra.mrb[0].mxu0 %vm472_vm1, %v455_v2  ;;  %v456_v15 = vld [vmem:[%s446_s27] sm:$0x1] }
  0x13   : > { %966 = vmatprep.mubr.msk.bf16.mxu0 %vm1053_vm0, %v1052_v1  ;;  %965 = vmatpush3.bf16.msra.mxu0 %v593_v14 }
  0x14   : > { %976 = vmatprep.subr.bf16.mxu0 %v1052_v1 }
  0x1a   : > { %967 = vmatmul.mubr.msk.bf16.vlgmr.msra.gmra.mrb[4].mxu0 %vm587_vm4, %v456_v15 }
  0x1b   : > { %980 = vmatprep.mubr.msk.bf16.mxu0 %vm1053_vm0, %v1052_v1  ;;  %977 = vmatpush3.bf16.msra.mxu0 %v1022_v16 }
  0x1c   : > { %978 = vmatprep.subr.bf16.mxu0 %v1052_v1 }
  0x1f   : > { %979 = vmatpush3.bf16.msra.mxu0 %v1023_v18 }
  0xe5   : > { %v510_v6 = vpop.f32.mrb[0].mxu0 }
  0xe6   : > { %v511_v7 = vadd.f32 %v915_v5, %v510_v6  ;;  %v954_v8 = vpop.f32.mrb[1].mxu0 }
  0xe7   : > { %v513_v9 = vpop.f32.mrb[2].mxu0 }
  0xe8   : > { %v516_v10 = vmax.f32 %v511_v7, 0.0  ;;  %v955_v11 = vpop.f32.mrb[3].mxu0 }
  0xea   : > { %v517_v12 = vpack.c.bf16 %v516_v10, %v516_v10 }
  0xec   : > { %961 = vmatmul.mubr.msk.bf16.vlgmr.msra.gmra.mrb[0].mxu1 %vm541_vm2, %v517_v12 }
  0xed   : > { %972 = vmatprep.mubr.msk.bf16.mxu1 %vm1053_vm0, %v1052_v1  ;;  %971 = vmatpush3.bf16.msra.mxu1 %v1021_v17  ;;  %v629_v27 = vpop.f32.mrb[4].mxu0 }
  0xee   : > { %984 = vmatprep.subr.bf16.mxu1 %v1052_v1  ;;  %v968_v28 = vpop.f32.mrb[5].mxu0  ;;  %v746_v41 = vrot.slane %v629_v27, %v745_v39 }
  0xef   : > { %v632_v29 = vpop.f32.mrb[6].mxu0 }
  0xf0   : > { %v969_v30 = vpop.f32.mrb[7].mxu0 }
  0xf4   : > { %973 = vmatmul.mubr.msk.bf16.vlgmr.msra.gmra.mrb[4].mxu1 %vm472_vm1, %v455_v2 }
  0xf5   : > { %988 = vmatprep.mubr.msk.bf16.mxu1 %vm1053_vm0, %v1052_v1  ;;  %985 = vmatpush3.bf16.msra.mxu1 %v1024_v35 }
  0xf6   : > { %986 = vmatprep.subr.bf16.mxu1 %v1052_v1 }
  0xf9   : > { %987 = vmatpush3.bf16.msra.mxu1 %v1025_v36 }
 0x1bf   : > { %v579_v20 = vpop.f32.mrb[0].mxu1 }
 0x1c0   : > { %v580_v21 = vadd.f32 %v918_v19, %v579_v20  ;;  %v962_v22 = vpop.f32.mrb[1].mxu1 }
 0x1c1   : > { %v582_v23 = vpop.f32.mrb[2].mxu1 }
 0x1c2   : > { %1026 = vtanh.f32 %v580_v21  ;;  %v963_v24 = vpop.f32.mrb[3].mxu1 }
 0x1c7   : > { %v682_v31 = vpop.f32.mrb[4].mxu1 }
 0x1c8   : > { %v974_v32 = vpop.f32.mrb[5].mxu1 }
 0x1c9   : > { %v685_v33 = vpop.f32.mrb[6].mxu1 }
 0x1ca   : > { %v975_v34 = vpop.f32.mrb[7].mxu1 }
 0x1cc   : > { %v1027_v25 = vpop.eup %1026 }
 0x1cd   : > { %v635_v26 = vpack.c.bf16 %v1027_v25, %v1027_v25 }
 0x1cf   : > { %981 = vmatmul.mubr.msk.bf16.vlgmr.msra.gmra.mrb[8].mxu0 %vm541_vm2, %v635_v26 }
 0x2a2   : > { %v737_v40 = vpop.f32.mrb[8].mxu0 }
 0x2a3   : > { %v738_v42 = vadd.f32 %v737_v40, %v682_v31  ;;  %v982_v43 = vpop.f32.mrb[9].mxu0 }
 0x2a4   : > { %v740_v45 = vpop.f32.mrb[10].mxu0 }
 0x2a5   : > { %v747_v46 = vadd.f32 %v746_v41, %v738_v42  ;;  %v983_v47 = vpop.f32.mrb[11].mxu0 }
 0x2a7   : > { %v755_v48 = vadd.f32 %v928_v44, %v747_v46 }
 0x2a9   : > { %v756_v49 = vmax.f32 %v755_v48, 0.0 }
 0x2ab   : > { %v757_v50 = vpack.c.bf16 %v756_v49, %v756_v49 }
 0x2ad   : > { %989 = vmatmul.mubr.msk.bf16.vlgmr.msra.gmra.mrb[8].mxu1 %vm541_vm2, %v757_v50 }
 0x380   : > { %v818_v52 = vpop.f32.mrb[8].mxu1 }
 0x381   : > { %v819_v53 = vadd.f32 %v929_v51, %v818_v52  ;;  %v990_v54 = vpop.f32.mrb[9].mxu1 }
 0x382   : > { %v821_v55 = vpop.f32.mrb[10].mxu1 }
 0x383   : > { %824 = vst [vmem:[%s453_s15] sm:$0xff] %v819_v53  ;;  %v991_v56 = vpop.f32.mrb[11].mxu1 }
 0x384 PF: > { %s22_s23 = sadd.s32 1, %s1050_s23   ;;  %s1238_s21 = smov %s1046_s22 }
 0x385   : > { %p19_p5 = scmp.ge.s32.totalorder %s22_s23, 4   ;;  %s1239_s22 = smov %s1241_s24 }
 0x387   :  { %21 = sbr.rel (!%p19_p5) target bundleno = 2 (0x2), region = 101 }

// kernel: _lambda_.2
= control target key start
LH: loop header
LB: loop body
LE: loop exit
PB: predicated region body
PF: predicated region fallthrough
CT: control target
= control target key end

     0   :  { %s1045_s17 = smov 0   ;;  %s1047_s18 = smov 0   ;;  %s1150_s0 = inlined_call_operand.vmem [shape: bf16[2,8,16], index: 0, kind: input, shape index: {}]   ;;  %s1151_s1 = inlined_call_operand.vmem [shape: bf16[2,8,11], index: 1, kind: input, shape index: {}]   ;;  %s1152_s2 = inlined_call_operand.vmem [shape: bf16[16,32], index: 2, kind: input, shape index: {}]   ;;  %s1153_s3 = inlined_call_operand.vmem [shape: f32[1,32], index: 3, kind: input, shape index: {}]   ;;  %s1154_s4 = inlined_call_operand.vmem [shape: bf16[32,32], index: 4, kind: input, shape index: {}]   ;;  %s1155_s5 = inlined_call_operand.vmem [shape: f32[1,32], index: 5, kind: input, shape index: {}]   ;;  %s1156_s6 = inlined_call_operand.vmem [shape: bf16[32,32], index: 6, kind: input, shape index: {}]   ;;  %s1157_s7 = inlined_call_operand.vmem [shape: bf16[11,32], index: 7, kind: input, shape index: {}]   ;;  %s1158_s8 = inlined_call_operand.vmem [shape: f32[1,32], index: 8, kind: input, shape index: {}]   ;;  %s1159_s9 = inlined_call_operand.vmem [shape: bf16[32,128], index: 9, kind: input, shape index: {}]   ;;  %s1160_s10 = inlined_call_operand.vmem [shape: f32[1,128], index: 10, kind: input, shape index: {}]   ;;  %s1161_s11 = inlined_call_operand.vmem [shape: f32[2,1,128], index: 11, kind: output, shape index: {}]  }
   0x1   :  { %s1049_s19 = smov 0  }
   0x2 LB: > { %s33_s20 = sadd.s32 1, %s976_s18  ;;  %p851_p0 = scmp.ge.s32.totalorder %s980_s19, 1  ;;  %s980_s19 = sphi %s1049_s19, %s21_s19   ;;  %s976_s18 = sphi %s1047_s18, %s1163_s18   ;;  %s972_s17 = sphi %s1045_s17, %s1162_s17  }
   0x3   : > { %p35_p1 = scmp.ge.s32.totalorder %s33_s20, 2  ;;  %p367_p2 = scmp.lt.s32.totalorder %s980_s19, 3 }
   0x5   : > { %s1165_s20 = smov (%p35_p1, %s33_s20), 0  ;;  %p368_p3 = pnand %p851_p0, %p367_p2 }
   0x6   : > { %v948_v0 = vld [vmem:[%s1152_s2] sm:$0xff] (!%p368_p3)   ;;  %v982_v1 = vmov (!%p368_p3), 0.0   ;;  %p414_p4 = scmp.lt.s32.totalorder (!%p368_p3), %s972_s17, 1  ;;  %vm983_vm0 = vmmov (!%p368_p3), 0   ;;  %vm455_vm1 = vcmask (!%p368_p3), 130048   ;;  %v950_v4 = vld [vmem:[%s1154_s4 + $0x8] sm:$0xff] (!%p368_p3)  }
   0x7   : > { %371 = sbr.rel (%p368_p3) target bundleno = 923 (0x39b), region = 64  ;;  %885 = vmatprep.subr.bf16.mxu0 (!%p368_p3), %v982_v1  ;;  %891 = vmatprep.subr.bf16.mxu1 (!%p368_p3), %v982_v1  ;;  %v949_v3 = vld [vmem:[%s1154_s4] sm:$0xff] (!%p368_p3)   ;;  %vm524_vm2 = vcmask (!%p368_p3), 261120   ;;  %vm585_vm3 = vcmask (!%p368_p3), 1044480   ;;  %vm586_vm4 = vcmask (!%p368_p3), 1045504   ;;  %v984_v14 = vmov (!%p368_p3), 65535  }
   0x8   : > { %886 = vmatpush3.bf16.msra.mxu0 (!%p368_p3), %v948_v0  ;;  %887 = vmatprep.mubr.msk.bf16.mxu0 (!%p368_p3), %vm983_vm0, %v982_v1  ;;  %v854_v5 = vld [vmem:[%s1153_s3] ss:$0 sm:$0xff] (!%p368_p3)  ;;  %v587_v15 = vsel (!%p368_p3), %vm585_vm3, 4294967295, %v984_v14  ;;  %v953_v19 = vld [vmem:[%s1156_s6 + $0x8] sm:$0xff] (!%p368_p3)   ;;  %vm581_vm5 = vcmask (!%p368_p3), 89088   ;;  %vm436_vm6 = vcmask (!%p368_p3), 253952  }
   0x9   : > { %895 = vmatprep.mubr.msk.bf16.mxu1 (!%p368_p3), %vm983_vm0, %v982_v1  ;;  %899 = vmatprep.subr.bf16.mxu0 (!%p368_p3), %v982_v1  ;;  %v951_v13 = vld [vmem:[%s1157_s7] sm:$0x3f] (!%p368_p3)   ;;  %v588_v16 = vsel (!%p368_p3), %vm586_vm4, %v587_v15, 0  ;;  %437 = vst.msk [vmem:[#allocation2] sm:$0x1] (!%p368_p3), %vm436_vm6, %v982_v1  ;;  %v955_v34 = vld [vmem:[%s1159_s9 + $0x8] sm:$0xff] (!%p368_p3)  }
   0xa   : > { %892 = vmatpush3.bf16.msra.mxu1 (!%p368_p3), %v949_v3  ;;  %v952_v17 = vld [vmem:[%s1156_s6] sm:$0xff] (!%p368_p3)   ;;  %v590_v18 = vand.u32 (!%p368_p3), %v951_v13, %v588_v16 }
   0xb   : > { %893 = vmatprep.subr.bf16.mxu1 (!%p368_p3), %v982_v1  ;;  %v857_v21 = vld [vmem:[%s1155_s5] ss:$0 sm:$0xff] (!%p368_p3) }
   0xc   : > { %v954_v33 = vld [vmem:[%s1159_s9] sm:$0xff] (!%p368_p3)  }
   0xd   : > { %v866_v36 = vld [vmem:[%s1158_s8] ss:$0 sm:$0xff] (!%p368_p3) }
   0xe   : > { %s1167_s17 = smov (!%p414_p4, %s972_s17), 1  ;;  %894 = vmatpush3.bf16.msra.mxu1 %v950_v4  ;;  %v717_v55 = vld [vmem:[%s1160_s10] sm:$0x1] }
   0xf   : > { %s852_s23 = sshll.u32 %s1167_s17, 2  ;;  %905 = vmatprep.subr.bf16.mxu1 %v982_v1 }
  0x10   : > { %s420_s26 = scalar_lea.vmem %s1150_s0, %s852_s23  ;;  %s427_s25 = scalar_lea.vmem %s1151_s1, %s852_s23  ;;  %v696_v49 = vld [vmem:[#allocation2] sm:$0x1] }
  0x11   : > { %v438_v2 = vld [vmem:[%s420_s26] sm:$0xf] }
  0x12   : > { %888 = vmatmul.mubr.msk.bf16.vlgmr.msra.gmra.mrb[0].mxu0 %vm455_vm1, %v438_v2  ;;  %v439_v20 = vld [vmem:[%s427_s25] sm:$0xf]  ;;  %s430_s25 = scalar_lea.vmem %s1161_s11, %s1167_s17 }
  0x13   : > { %901 = vmatprep.mubr.msk.bf16.mxu0 %vm983_vm0, %v982_v1  ;;  %900 = vmatpush3.bf16.msra.mxu0 %v590_v18 }
  0x14   : > { %913 = vmatprep.subr.bf16.mxu0 %v982_v1 }
  0x1a   : > { %902 = vmatmul.mubr.msk.bf16.vlgmr.msra.gmra.mrb[4].mxu0 %vm581_vm5, %v439_v20 }
  0x1b   : > { %917 = vmatprep.mubr.msk.bf16.mxu0 %vm983_vm0, %v982_v1  ;;  %914 = vmatpush3.bf16.msra.mxu0 %v954_v33 }
  0x1c   : > { %915 = vmatprep.subr.bf16.mxu0 %v982_v1 }
  0x1f   : > { %916 = vmatpush3.bf16.msra.mxu0 %v955_v34 }
  0xe5   : > { %v493_v6 = vpop.f32.mrb[0].mxu0 }
  0xe6   : > { %v494_v7 = vadd.f32 %v854_v5, %v493_v6  ;;  %v889_v8 = vpop.f32.mrb[1].mxu0 }
  0xe7   : > { %v496_v9 = vpop.f32.mrb[2].mxu0 }
  0xe8   : > { %v499_v10 = vmax.f32 %v494_v7, 0.0  ;;  %v890_v11 = vpop.f32.mrb[3].mxu0 }
  0xea   : > { %v500_v12 = vpack.c.bf16 %v499_v10, %v499_v10 }
  0xec   : > { %896 = vmatmul.mubr.msk.bf16.vlgmr.msra.gmra.mrb[0].mxu1 %vm524_vm2, %v500_v12 }
  0xed   : > { %909 = vmatprep.mubr.msk.bf16.mxu1 %vm983_vm0, %v982_v1  ;;  %906 = vmatpush3.bf16.msra.mxu1 %v952_v17  ;;  %v626_v29 = vpop.f32.mrb[4].mxu0 }
  0xee   : > { %907 = vmatprep.subr.bf16.mxu1 %v982_v1  ;;  %v903_v30 = vpop.f32.mrb[5].mxu0 }
  0xef   : > { %v629_v31 = vpop.f32.mrb[6].mxu0 }
  0xf0   : > { %v904_v32 = vpop.f32.mrb[7].mxu0 }
  0xf1   : > { %908 = vmatpush3.bf16.msra.mxu1 %v953_v19 }
 0x1bf   : > { %v562_v22 = vpop.f32.mrb[0].mxu1 }
 0x1c0   : > { %v563_v23 = vadd.f32 %v857_v21, %v562_v22  ;;  %v897_v24 = vpop.f32.mrb[1].mxu1 }
 0x1c1   : > { %v565_v25 = vpop.f32.mrb[2].mxu1 }
 0x1c2   : > { %956 = vtanh.f32 %v563_v23  ;;  %v898_v26 = vpop.f32.mrb[3].mxu1 }
 0x1cc   : > { %v957_v27 = vpop.eup %956 }
 0x1cd   : > { %v569_v28 = vpack.c.bf16 %v957_v27, %v957_v27 }
 0x1cf   : > { %910 = vmatmul.mubr.msk.bf16.vlgmr.msra.gmra.mrb[4].mxu1 %vm524_vm2, %v569_v28 }
 0x2a2   : > { %v681_v35 = vpop.f32.mrb[4].mxu1 }
 0x2a3   : > { %v682_v37 = vadd.f32 %v681_v35, %v626_v29  ;;  %v911_v38 = vpop.f32.mrb[5].mxu1 }
 0x2a4   : > { %v684_v39 = vpop.f32.mrb[6].mxu1 }
 0x2a5   : > { %v694_v40 = vadd.f32 %v866_v36, %v682_v37  ;;  %v912_v41 = vpop.f32.mrb[7].mxu1 }
 0x2a7   : > { %v695_v42 = vmax.f32 %v694_v40, 0.0 }
 0x2a9   : > { %v697_v43 = vsel %vm524_vm2, %v695_v42, 0.0 }
 0x2aa   : > { %v698_v44 = vrot.slane %v697_v43, 4 }
 0x2ac   : > { %v699_v45 = vadd.f32 %v698_v44, %v697_v43 }
 0x2ae   : > { %v700_v46 = vrot.slane %v699_v45, 2 }
 0x2b0   : > { %v701_v47 = vadd.f32 %v700_v46, %v699_v45 }
 0x2b2   : > { %v702_v48 = vrot.slane %v701_v47, 1 }
 0x2b4   : > { %v703_v50 = vadd.f32 %v702_v48, %v701_v47 }
 0x2b6   : > { %v704_v51 = vadd.f32 %v703_v50, %v696_v49 }
 0x2b8   : > { %706 = vst.msk [vmem:[#allocation2] sm:$0x1] %vm436_vm6, %v704_v51 }
 0x2bf   : > { %v710_v52 = vld [vmem:[#allocation2] sm:$0x1] }
 0x2c0   : > { %v711_v53 = vmul.f32 0.125, %v710_v52 }
 0x2c2   : > { %v712_v54 = vpack.c.bf16 %v711_v53, %v711_v53 }
 0x2c4   : > { %918 = vmatmul.mubr.msk.bf16.vlgmr.msra.gmra.mrb[8].mxu0 %vm524_vm2, %v712_v54 }
 0x397   : > { %v767_v56 = vpop.f32.mrb[8].mxu0 }
 0x398   : > { %v768_v57 = vadd.f32 %v767_v56, %v717_v55  ;;  %v919_v58 = vpop.f32.mrb[9].mxu0 }
 0x399   : > { %v770_v59 = vpop.f32.mrb[10].mxu0 }
 0x39a   : > { %773 = vst [vmem:[%s430_s25] sm:$0x1] %v768_v57  ;;  %v920_v60 = vpop.f32.mrb[11].mxu0 }
 0x39b PF: > { %s21_s19 = sadd.s32 1, %s980_s19   ;;  %s1162_s17 = smov %s976_s18 }
 0x39c   : > { %p18_p5 = scmp.ge.s32.totalorder %s21_s19, 4   ;;  %s1163_s18 = smov %s1165_s20 }
 0x39e   :  { %20 = sbr.rel (!%p18_p5) target bundleno = 2 (0x2), region = 105 }

</bundles_post_ra>
